<compile_context>
chip_gen: v6e
topology: v6e:2x2x1
jax: 0.10.0
libtpu: 0.0.40
codegen_flags: <defaults>
</compile_context>

<pallas_src>
import math
import functools

import jax
import jax.numpy as jnp
from jax.experimental import pallas as pl
from jax.experimental.pallas import tpu as pltpu


def _layer_norm(x, gamma, beta, eps=1e-5):
    """Row-wise LayerNorm in f32 (matches F.layer_norm with weight & bias, eps=1e-5)."""
    x = x.astype(jnp.float32)
    mu = jnp.mean(x, axis=-1, keepdims=True)
    xc = x - mu
    var = jnp.mean(xc * xc, axis=-1, keepdims=True)
    return xc * jax.lax.rsqrt(var + eps) * gamma + beta


# --------------------------------------------------------------------------------------
# Kernel 1: LN1 + fused QKV projection (runs once per row; review items 1 & 3)
# --------------------------------------------------------------------------------------
def _qkv_prepass_kernel(x_ref, ln1_g_ref, ln1_b_ref, wqkv_ref, bqkv_ref,
                        ln1x_ref, q_ref, k_ref, v_ref,
                        *, n_head, head_dim, compute_dtype):
    H, D = n_head, head_dim
    C = H * D
    cd = compute_dtype

    ln_x = _layer_norm(x_ref[0], ln1_g_ref[...], ln1_b_ref[...])            # (TR, C) f32
    ln1x_ref[0] = ln_x.astype(ln1x_ref.dtype)                               # residual base

    qkv = jnp.dot(ln_x.astype(cd), wqkv_ref[...],
                  preferred_element_type=jnp.float32) + bqkv_ref[...]       # (TR, 3C) f32
    q = qkv[:, :C] * (1.0 / math.sqrt(D))        # fold attention scale into Q once
    k = qkv[:, C:2 * C]
    v = qkv[:, 2 * C:]

    # Head split into head-major HBM layout.  This per-head store loop runs once per
    # row tile of the whole sequence (O(T/TR) total), NOT in the attention hot loop.
    for h in range(H):
        q_ref[0, h] = q[:, h * D:(h + 1) * D].astype(cd)
        k_ref[0, h] = k[:, h * D:(h + 1) * D].astype(cd)
        v_ref[0, h] = v[:, h * D:(h + 1) * D].astype(cd)


# --------------------------------------------------------------------------------------
# Kernel 2: flash attention + output projection + LN2 + FFN (fused)
# --------------------------------------------------------------------------------------
def _attn_ffn_kernel(ln1x_ref, q_ref, k_ref, v_ref,
                     wp_ref, bp_ref, ln2_g_ref, ln2_b_ref,
                     w1_ref, b1_ref, w2_ref, b2_ref,
                     o_ref,
                     m_sc, l_sc, acc_sc, merge_sc,
                     *, n_head, head_dim, compute_dtype, bf16_exp):
    H, D = n_head, head_dim
    C = H * D
    cd = compute_dtype
    ki = pl.program_id(2)

    # ---- once per query tile: reset flash accumulators ----
    @pl.when(ki == 0)
    def _init():
        m_sc[...] = jnp.full_like(m_sc, -jnp.inf)
        l_sc[...] = jnp.zeros_like(l_sc)
        acc_sc[...] = jnp.zeros_like(acc_sc)

    # ---- hot loop (every KV tile): online-softmax update only (no projections) ----
    s = jnp.einsum('hqd,hkd->hqk', q_ref[0], k_ref[0],
                   preferred_element_type=jnp.float32)                      # (H, TQ, TK)
    m_new = jnp.maximum(m_sc[...], jnp.max(s, axis=-1, keepdims=True))
    alpha = jnp.exp(m_sc[...] - m_new)                                      # f32, tiny
    delta = s - m_new
    if bf16_exp:
        # bf16 EUP (v6e/v7x): roughly doubles exp throughput; p is cast to bf16 for the
        # PV matmul anyway.  Running sum / rescale stay in f32 (review item 10).
        p = jnp.exp(delta.astype(jnp.bfloat16))
    else:
        p = jnp.exp(delta)
    l_sc[...] = alpha * l_sc[...] + jnp.sum(p.astype(jnp.float32),
                                            axis=-1, keepdims=True)
    acc_sc[...] = alpha * acc_sc[...] + jnp.einsum(
        'hqk,hkd->hqd', p.astype(cd), v_ref[0],
        preferred_element_type=jnp.float32)
    m_sc[...] = m_new

    # ---- once per query tile (last KV step): finish attention, proj, LN2, FFN ----
    @pl.when(ki == pl.num_programs(2) - 1)
    def _finalize():
        y = acc_sc[...] * pl.reciprocal(l_sc[...], approx=True)             # (H, TQ, D) f32
        # Merge heads lane-dense (TQ, C) via H static lane-slice stores (once per query
        # tile), then ONE full-K (TQ,C)@(C,C) output projection -> fills the MXU and
        # avoids the old (H, TQ, C) f32 intermediate (review item 2).
        for h in range(H):
            merge_sc[:, h * D:(h + 1) * D] = y[h]
        attn_out = jnp.dot(merge_sc[...].astype(cd), wp_ref[...],
                           preferred_element_type=jnp.float32) + bp_ref[...]  # (TQ, C)

        x2 = ln1x_ref[0].astype(jnp.float32) + attn_out    # x = ln_1(x); x = x + attn(x)
        x3 = _layer_norm(x2, ln2_g_ref[...], ln2_b_ref[...])                 # x = ln_2(x)
        h1 = jnp.dot(x3.astype(cd), w1_ref[...],
                     preferred_element_type=jnp.float32) + b1_ref[...]
        h1 = jnp.maximum(h1, 0.0)                                            # ReLU
        mlp = jnp.dot(h1.astype(cd), w2_ref[...],
                      preferred_element_type=jnp.float32) + b2_ref[...]
        # dropouts are identity in eval mode
        o_ref[0] = (x3 + mlp).astype(o_ref.dtype)                            # x = x + mlp(x)


# --------------------------------------------------------------------------------------
# Wrapper
# --------------------------------------------------------------------------------------
def _tpu_defaults():
    """Per-generation defaults: (tile_rows, vmem_limit_bytes, bf16_exp).

    v6e: 128 MiB VMEM, 2x256^2 MXU, bf16 EUP  -> 256 tiles, ~100 MiB limit, bf16 exp.
    v7x:  64 MiB VMEM, bf16 EUP               -> 128 tiles, ~48 MiB limit, bf16 exp.
    v5e: 128 MiB VMEM, 4x128^2 MXU, no bf16 EUP -> 128 tiles, ~100 MiB limit, f32 exp.
    unknown: conservative (no explicit limit, f32 exp).
    """
    try:
        kind = jax.devices()[0].device_kind.lower()
    except Exception:
        kind = ""
    if "v7" in kind or "tpu7" in kind or "7x" in kind:
        return 128, 48 * 1024 * 1024, True
    if "v6" in kind or "trillium" in kind:
        return 256, 100 * 1024 * 1024, True
    if "v5 lite" in kind or "v5e" in kind or "v5lite" in kind:
        return 128, 100 * 1024 * 1024, False
    return 128, None, False


def encoder_layer(x, params, *, n_head, block_q=None, block_k=None, block_r=None,
                  compute_dtype=jnp.bfloat16, bf16_exp=None, vmem_limit_bytes=None):
    """x: (B, T, C).  params (natural shapes):
       (ln1_g, ln1_b, wq, bq, wk, bk, wv, bv, wp, bp, ln2_g, ln2_b, w1, b1, w2, b2)
       with weights as (C_in, C_out) and biases / LN params as 1-D vectors."""
    (ln1_g, ln1_b, wq, bq, wk, bk, wv, bv, wp, bp,
     ln2_g, ln2_b, w1, b1, w2, b2) = params
    B, T, C = x.shape
    assert C % n_head == 0, "n_embd must be divisible by n_head"
    H = n_head
    D = C // H

    def_block, def_vmem, def_bf16_exp = _tpu_defaults()
    if vmem_limit_bytes is None:
        vmem_limit_bytes = def_vmem
    if bf16_exp is None:
        bf16_exp = def_bf16_exp

    TQ = block_q if block_q is not None else min(T, def_block)
    TK = block_k if block_k is not None else min(T, def_block)
    TR = block_r if block_r is not None else min(T, 128)
    for blk in (TQ, TK, TR):
        assert T % blk == 0, "T must be divisible by the tile sizes"
        # Q/K/V intermediates are bf16: keep tile rows a multiple of 16 (review item 12)
        assert blk % 16 == 0 or blk == T, "tile sizes should be multiples of 16"

    f32 = jnp.float32
    cd = compute_dtype
    row = lambda v: jnp.asarray(v).reshape(1, -1).astype(f32)

    # ------------------------------ weight prep (plain JAX) ------------------------------
    wqkv = jnp.concatenate([wq, wk, wv], axis=1).astype(cd)                  # (C, 3C)
    bqkv = jnp.concatenate(
        [jnp.ravel(bq), jnp.ravel(bk), jnp.ravel(bv)]).reshape(1, -1).astype(f32)

    # ------------------------------ kernel 1: LN1 + QKV ------------------------------
    prep_kernel = functools.partial(_qkv_prepass_kernel, n_head=H, head_dim=D,
                                    compute_dtype=cd)
    fixed2 = lambda shape: pl.BlockSpec(shape, lambda b, r: (0,) * len(shape))

    ln1x, q_hm, k_hm, v_hm = pl.pallas_call(
        prep_kernel,
        out_shape=(
            jax.ShapeDtypeStruct((B, T, C), f32),        # ln1(x), residual base
            jax.ShapeDtypeStruct((B, H, T, D), cd),      # Q (head-major, pre-scaled)
            jax.ShapeDtypeStruct((B, H, T, D), cd),      # K (head-major)
            jax.ShapeDtypeStruct((B, H, T, D), cd),      # V (head-major)
        ),
        grid_spec=pltpu.PrefetchScalarGridSpec(
            num_scalar_prefetch=0,
            grid=(B, T // TR),
            in_specs=[
                pl.BlockSpec((1, TR, C), lambda b, r: (b, r, 0)),
                fixed2((1, C)), fixed2((1, C)),                              # ln1 g, b
                fixed2((C, 3 * C)), fixed2((1, 3 * C)),                      # wqkv, bqkv
            ],
            out_specs=[
                pl.BlockSpec((1, TR, C), lambda b, r: (b, r, 0)),
                pl.BlockSpec((1, H, TR, D), lambda b, r: (b, 0, r, 0)),
                pl.BlockSpec((1, H, TR, D), lambda b, r: (b, 0, r, 0)),
                pl.BlockSpec((1, H, TR, D), lambda b, r: (b, 0, r, 0)),
            ]),
        compiler_params=pltpu.CompilerParams(
            dimension_semantics=("parallel", "parallel"),
            vmem_limit_bytes=vmem_limit_bytes),
    )(x, row(ln1_g), row(ln1_b), wqkv, bqkv)

    # --------------------- kernel 2: flash attention + proj + LN2 + FFN ---------------------
    main_kernel = functools.partial(_attn_ffn_kernel, n_head=H, head_dim=D,
                                    compute_dtype=cd, bf16_exp=bool(bf16_exp))
    fixed3 = lambda shape: pl.BlockSpec(shape, lambda b, qi, ki: (0,) * len(shape))

    # Advisory cost estimate for XLA scheduling around this long custom call (item 12).
    flops = 18 * B * T * C * C + 4 * B * T * T * C
    transcendentals = B * H * T * T
    bytes_accessed = (B * T * C * (4 + 2)                       # ln1x + Q reads
                      + 2 * B * T * C * 2 * (T // TQ)           # K/V re-reads
                      + 9 * C * C * 2                           # resident weights
                      + B * T * C * jnp.dtype(x.dtype).itemsize)  # output write

    out = pl.pallas_call(
        main_kernel,
        out_shape=jax.ShapeDtypeStruct((B, T, C), x.dtype),
        grid_spec=pltpu.PrefetchScalarGridSpec(
            num_scalar_prefetch=0,
            grid=(B, T // TQ, T // TK),
            in_specs=[
                pl.BlockSpec((1, TQ, C), lambda b, qi, ki: (b, qi, 0)),        # ln1(x)
                pl.BlockSpec((1, H, TQ, D), lambda b, qi, ki: (b, 0, qi, 0)),  # Q
                pl.BlockSpec((1, H, TK, D), lambda b, qi, ki: (b, 0, ki, 0)),  # K
                pl.BlockSpec((1, H, TK, D), lambda b, qi, ki: (b, 0, ki, 0)),  # V
                fixed3((C, C)), fixed3((1, C)),                                # wp, bp
                fixed3((1, C)), fixed3((1, C)),                                # ln2 g, b
                fixed3((C, 4 * C)), fixed3((1, 4 * C)),                        # w1, b1
                fixed3((4 * C, C)), fixed3((1, C)),                            # w2, b2
            ],
            out_specs=pl.BlockSpec((1, TQ, C), lambda b, qi, ki: (b, qi, 0)),
            scratch_shapes=[
                pltpu.VMEM((H, TQ, 1), f32),      # online-softmax running max
                pltpu.VMEM((H, TQ, 1), f32),      # online-softmax running sum
                pltpu.VMEM((H, TQ, D), f32),      # attention accumulator (head-major)
                pltpu.VMEM((TQ, C), f32),         # lane-dense head merge for out-proj
            ]),
        compiler_params=pltpu.CompilerParams(
            dimension_semantics=("parallel", "parallel", "arbitrary"),
            vmem_limit_bytes=vmem_limit_bytes),
        cost_estimate=pl.CostEstimate(
            flops=int(flops),
            transcendentals=int(transcendentals),
            bytes_accessed=int(bytes_accessed)),
    )(ln1x, q_hm, k_hm, v_hm,
      wp.astype(cd), row(bp), row(ln2_g), row(ln2_b),
      w1.astype(cd), row(b1), w2.astype(cd), row(b2))
    return out


# --------------------------------------------------------------------------------------
# Pure-JAX reference (mirrors the PyTorch EncoderLayer forward in eval mode)
# --------------------------------------------------------------------------------------
def encoder_layer_reference(x, params, *, n_head, compute_dtype=jnp.bfloat16):
    (ln1_g, ln1_b, wq, bq, wk, bk, wv, bv, wp, bp,
     ln2_g, ln2_b, w1, b1, w2, b2) = params
    B, T, C = x.shape
    D = C // n_head
    f32 = jnp.float32
    cd = compute_dtype
    hi = jax.lax.Precision.HIGHEST

    def ln(z, g, b):
        z = z.astype(f32)
        mu = jnp.mean(z, axis=-1, keepdims=True)
        var = jnp.mean((z - mu) ** 2, axis=-1, keepdims=True)
        return (z - mu) * jax.lax.rsqrt(var + 1e-5) * g.astype(f32) + b.astype(f32)

    def linear(z, w, b):
        return jnp.dot(z.astype(cd), w.astype(cd), precision=hi,
                       preferred_element_type=f32) + b.astype(f32)

    x1 = ln(x, ln1_g, ln1_b)
    q = linear(x1, wq, bq).reshape(B, T, n_head, D).transpose(0, 2, 1, 3)
    k = linear(x1, wk, bk).reshape(B, T, n_head, D).transpose(0, 2, 1, 3)
    v = linear(x1, wv, bv).reshape(B, T, n_head, D).transpose(0, 2, 1, 3)
    att = jnp.einsum('bhqd,bhkd->bhqk', q.astype(cd), k.astype(cd),
                     precision=hi, preferred_element_type=f32) / math.sqrt(D)
    att = jax.nn.softmax(att, axis=-1)
    y = jnp.einsum('bhqk,bhkd->bhqd', att.astype(cd), v.astype(cd),
                   precision=hi, preferred_element_type=f32)
    y = y.transpose(0, 2, 1, 3).reshape(B, T, C)
    x2 = x1 + linear(y, wp, bp)
    x3 = ln(x2, ln2_g, ln2_b)
    h = jnp.maximum(linear(x3, w1, b1), 0.0)
    return (x3 + linear(h, w2, b2)).astype(x.dtype)


if __name__ == "__main__":
    # Small config consistent with the module: n_embd divisible by n_head.
    # T=32 with 16-row tiles exercises the full (B, q-tile, kv-tile) grid and the
    # online-softmax accumulation across multiple KV steps.
    B, T, C, H = 2, 32, 64, 4
    dtype = jnp.float32

    ks = jax.random.split(jax.random.PRNGKey(0), 18)
    x = jax.random.normal(ks[0], (B, T, C), dtype=dtype)

    def init_linear(kw, kb, fan_in, fan_out):
        bound = 1.0 / math.sqrt(fan_in)
        w = jax.random.uniform(kw, (fan_in, fan_out), dtype, -bound, bound)
        b = jax.random.uniform(kb, (fan_out,), dtype, -bound, bound)
        return w, b

    wq, bq = init_linear(ks[1], ks[2], C, C)
    wk, bk = init_linear(ks[3], ks[4], C, C)
    wv, bv = init_linear(ks[5], ks[6], C, C)
    wp, bp = init_linear(ks[7], ks[8], C, C)
    w1, b1 = init_linear(ks[9], ks[10], C, 4 * C)
    w2, b2 = init_linear(ks[11], ks[12], 4 * C, C)
    ln1_g = 1.0 + 0.1 * jax.random.normal(ks[13], (C,), dtype)
    ln1_b = 0.1 * jax.random.normal(ks[14], (C,), dtype)
    ln2_g = 1.0 + 0.1 * jax.random.normal(ks[15], (C,), dtype)
    ln2_b = 0.1 * jax.random.normal(ks[16], (C,), dtype)

    params = (ln1_g, ln1_b, wq, bq, wk, bk, wv, bv, wp, bp,
              ln2_g, ln2_b, w1, b1, w2, b2)

    out = encoder_layer(x, params, n_head=H, block_q=16, block_k=16, block_r=16,
                        compute_dtype=jnp.bfloat16)
    out = jax.block_until_ready(out)

    ref = encoder_layer_reference(x, params, n_head=H, compute_dtype=jnp.bfloat16)
    assert out.shape == (B, T, C)
    # Tolerance reflects bf16 matmul operands, (optionally) bf16 exponentials, and the
    # approximate (EUP) softmax reciprocal; LN / softmax state / accumulators are f32.
    max_diff = float(jnp.max(jnp.abs(out - ref)))
    assert jnp.allclose(out, ref, atol=2e-2, rtol=2e-2), (
        f"mismatch vs reference, max abs diff = {max_diff}")
    print("KERNEL_OK")
</pallas_src>

<mosaic_0001>
module attributes {stable_mosaic.version = 11 : i64} {
  func.func @_qkv_prepass_kernel(%arg0: i32, %arg1: i32, %arg2: memref<1x16x64xf32, #tpu.memory_space<vmem>>, %arg3: memref<1x64xf32, #tpu.memory_space<vmem>>, %arg4: memref<1x64xf32, #tpu.memory_space<vmem>>, %arg5: memref<64x192xbf16, #tpu.memory_space<vmem>>, %arg6: memref<1x192xf32, #tpu.memory_space<vmem>>, %arg7: memref<1x16x64xf32, #tpu.memory_space<vmem>>, %arg8: memref<1x4x16x16xbf16, #tpu.memory_space<vmem>>, %arg9: memref<1x4x16x16xbf16, #tpu.memory_space<vmem>>, %arg10: memref<1x4x16x16xbf16, #tpu.memory_space<vmem>>) attributes {dimension_semantics = [#tpu.dimension_semantics<parallel>, #tpu.dimension_semantics<parallel>], iteration_bounds = array<i64: 2, 2>, scalar_prefetch = 0 : i64, scratch_operands = 0 : i64, tpu.core_type = #tpu.core_type<tc>, window_params = [{transform_indices = @transform_0, window_bounds = array<i64: 1, 16, 64>}, {pipeline_mode = #tpu.pipeline_mode<synchronous>, transform_indices = @transform_1, window_bounds = array<i64: 1, 64>}, {pipeline_mode = #tpu.pipeline_mode<synchronous>, transform_indices = @transform_2, window_bounds = array<i64: 1, 64>}, {pipeline_mode = #tpu.pipeline_mode<synchronous>, transform_indices = @transform_3, window_bounds = array<i64: 64, 192>}, {pipeline_mode = #tpu.pipeline_mode<synchronous>, transform_indices = @transform_4, window_bounds = array<i64: 1, 192>}, {transform_indices = @transform_5, window_bounds = array<i64: 1, 16, 64>}, {transform_indices = @transform_6, window_bounds = array<i64: 1, 4, 16, 16>}, {transform_indices = @transform_7, window_bounds = array<i64: 1, 4, 16, 16>}, {transform_indices = @transform_8, window_bounds = array<i64: 1, 4, 16, 16>}]} {
    %c0 = arith.constant 0 : index
    %c0_0 = arith.constant 0 : index
    %c0_1 = arith.constant 0 : index
    %0 = vector.load %arg2[%c0, %c0_0, %c0_1] : memref<1x16x64xf32, #tpu.memory_space<vmem>>, vector<1x16x64xf32>
    %1 = vector.shape_cast %0 : vector<1x16x64xf32> to vector<16x64xf32>
    %c0_2 = arith.constant 0 : index
    %c0_3 = arith.constant 0 : index
    %2 = vector.load %arg3[%c0_2, %c0_3] : memref<1x64xf32, #tpu.memory_space<vmem>>, vector<1x64xf32>
    %c0_4 = arith.constant 0 : index
    %c0_5 = arith.constant 0 : index
    %3 = vector.load %arg4[%c0_4, %c0_5] : memref<1x64xf32, #tpu.memory_space<vmem>>, vector<1x64xf32>
    %cst = arith.constant dense<0.000000e+00> : vector<16xf32>
    %4 = vector.multi_reduction <add>, %1, %cst [1] : vector<16x64xf32> to vector<16xf32>
    %5 = vector.shape_cast %4 : vector<16xf32> to vector<16x1xf32>
    %cst_6 = arith.constant 6.400000e+01 : f32
    %6 = vector.broadcast %cst_6 : f32 to vector<16x1xf32>
    %7 = arith.divf %5, %6 : vector<16x1xf32>
    %8 = vector.broadcast %7 : vector<16x1xf32> to vector<16x64xf32>
    %9 = arith.subf %1, %8 : vector<16x64xf32>
    %10 = arith.mulf %9, %9 : vector<16x64xf32>
    %cst_7 = arith.constant dense<0.000000e+00> : vector<16xf32>
    %11 = vector.multi_reduction <add>, %10, %cst_7 [1] : vector<16x64xf32> to vector<16xf32>
    %12 = vector.shape_cast %11 : vector<16xf32> to vector<16x1xf32>
    %cst_8 = arith.constant 6.400000e+01 : f32
    %13 = vector.broadcast %cst_8 : f32 to vector<16x1xf32>
    %14 = arith.divf %12, %13 : vector<16x1xf32>
    %cst_9 = arith.constant 9.99999974E-6 : f32
    %15 = vector.broadcast %cst_9 : f32 to vector<16x1xf32>
    %16 = arith.addf %14, %15 : vector<16x1xf32>
    %17 = math.rsqrt %16 : vector<16x1xf32>
    %18 = vector.broadcast %17 : vector<16x1xf32> to vector<16x64xf32>
    %19 = arith.mulf %9, %18 : vector<16x64xf32>
    %20 = vector.broadcast %2 : vector<1x64xf32> to vector<16x64xf32>
    %21 = arith.mulf %19, %20 : vector<16x64xf32>
    %22 = vector.broadcast %3 : vector<1x64xf32> to vector<16x64xf32>
    %23 = arith.addf %21, %22 : vector<16x64xf32>
    %c0_10 = arith.constant 0 : index
    %c0_11 = arith.constant 0 : index
    %c0_12 = arith.constant 0 : index
    %24 = vector.load %arg7[%c0_10, %c0_11, %c0_12] : memref<1x16x64xf32, #tpu.memory_space<vmem>>, vector<1x16x64xf32>
    %25 = vector.shape_cast %24 : vector<1x16x64xf32> to vector<16x64xf32>
    %26 = vector.shape_cast %23 : vector<16x64xf32> to vector<1x16x64xf32>
    tpu.vector_store %arg7[%c0_10, %c0_11, %c0_12], %26 {strides = array<i32>} : memref<1x16x64xf32, #tpu.memory_space<vmem>>, vector<1x16x64xf32>,
    %27 = arith.truncf %23 : vector<16x64xf32> to vector<16x64xbf16>
    %c0_13 = arith.constant 0 : index
    %c0_14 = arith.constant 0 : index
    %28 = vector.load %arg5[%c0_13, %c0_14] : memref<64x192xbf16, #tpu.memory_space<vmem>>, vector<64x192xbf16>
    %cst_15 = arith.constant dense<0.000000e+00> : vector<16x192xf32>
    %29 = tpu.matmul %27, %28, %cst_15 {dimension_numbers = #tpu.dot_dimension_numbers<[1], [0], [0], [1], [0, 0, 1, 1], [], []>} : vector<16x64xbf16>, vector<64x192xbf16>, vector<16x192xf32> -> vector<16x192xf32>
    %c0_16 = arith.constant 0 : index
    %c0_17 = arith.constant 0 : index
    %30 = vector.load %arg6[%c0_16, %c0_17] : memref<1x192xf32, #tpu.memory_space<vmem>>, vector<1x192xf32>
    %31 = vector.broadcast %30 : vector<1x192xf32> to vector<16x192xf32>
    %32 = arith.addf %29, %31 : vector<16x192xf32>
    %33 = vector.extract_strided_slice %32 {offsets = [0, 0], sizes = [16, 64], strides = [1, 1]} : vector<16x192xf32> to vector<16x64xf32>
    %cst_18 = arith.constant 2.500000e-01 : f32
    %34 = vector.broadcast %cst_18 : f32 to vector<16x64xf32>
    %35 = arith.mulf %33, %34 : vector<16x64xf32>
    %36 = vector.extract_strided_slice %32 {offsets = [0, 64], sizes = [16, 64], strides = [1, 1]} : vector<16x192xf32> to vector<16x64xf32>
    %37 = vector.extract_strided_slice %32 {offsets = [0, 128], sizes = [16, 64], strides = [1, 1]} : vector<16x192xf32> to vector<16x64xf32>
    %38 = vector.extract_strided_slice %35 {offsets = [0, 0], sizes = [16, 16], strides = [1, 1]} : vector<16x64xf32> to vector<16x16xf32>
    %39 = arith.truncf %38 : vector<16x16xf32> to vector<16x16xbf16>
    %c0_19 = arith.constant 0 : index
    %c0_20 = arith.constant 0 : index
    %c0_21 = arith.constant 0 : index
    %c0_22 = arith.constant 0 : index
    %40 = vector.load %arg8[%c0_19, %c0_20, %c0_21, %c0_22] : memref<1x4x16x16xbf16, #tpu.memory_space<vmem>>, vector<1x1x16x16xbf16>
    %41 = vector.shape_cast %40 : vector<1x1x16x16xbf16> to vector<16x16xbf16>
    %42 = vector.shape_cast %39 : vector<16x16xbf16> to vector<1x1x16x16xbf16>
    tpu.vector_store %arg8[%c0_19, %c0_20, %c0_21, %c0_22], %42 {strides = array<i32>} : memref<1x4x16x16xbf16, #tpu.memory_space<vmem>>, vector<1x1x16x16xbf16>,
    %43 = vector.extract_strided_slice %36 {offsets = [0, 0], sizes = [16, 16], strides = [1, 1]} : vector<16x64xf32> to vector<16x16xf32>
    %44 = arith.truncf %43 : vector<16x16xf32> to vector<16x16xbf16>
    %c0_23 = arith.constant 0 : index
    %c0_24 = arith.constant 0 : index
    %c0_25 = arith.constant 0 : index
    %c0_26 = arith.constant 0 : index
    %45 = vector.load %arg9[%c0_23, %c0_24, %c0_25, %c0_26] : memref<1x4x16x16xbf16, #tpu.memory_space<vmem>>, vector<1x1x16x16xbf16>
    %46 = vector.shape_cast %45 : vector<1x1x16x16xbf16> to vector<16x16xbf16>
    %47 = vector.shape_cast %44 : vector<16x16xbf16> to vector<1x1x16x16xbf16>
    tpu.vector_store %arg9[%c0_23, %c0_24, %c0_25, %c0_26], %47 {strides = array<i32>} : memref<1x4x16x16xbf16, #tpu.memory_space<vmem>>, vector<1x1x16x16xbf16>,
    %48 = vector.extract_strided_slice %37 {offsets = [0, 0], sizes = [16, 16], strides = [1, 1]} : vector<16x64xf32> to vector<16x16xf32>
    %49 = arith.truncf %48 : vector<16x16xf32> to vector<16x16xbf16>
    %c0_27 = arith.constant 0 : index
    %c0_28 = arith.constant 0 : index
    %c0_29 = arith.constant 0 : index
    %c0_30 = arith.constant 0 : index
    %50 = vector.load %arg10[%c0_27, %c0_28, %c0_29, %c0_30] : memref<1x4x16x16xbf16, #tpu.memory_space<vmem>>, vector<1x1x16x16xbf16>
    %51 = vector.shape_cast %50 : vector<1x1x16x16xbf16> to vector<16x16xbf16>
    %52 = vector.shape_cast %49 : vector<16x16xbf16> to vector<1x1x16x16xbf16>
    tpu.vector_store %arg10[%c0_27, %c0_28, %c0_29, %c0_30], %52 {strides = array<i32>} : memref<1x4x16x16xbf16, #tpu.memory_space<vmem>>, vector<1x1x16x16xbf16>,
    %53 = vector.extract_strided_slice %35 {offsets = [0, 16], sizes = [16, 16], strides = [1, 1]} : vector<16x64xf32> to vector<16x16xf32>
    %54 = arith.truncf %53 : vector<16x16xf32> to vector<16x16xbf16>
    %c0_31 = arith.constant 0 : index
    %c1 = arith.constant 1 : index
    %c0_32 = arith.constant 0 : index
    %c0_33 = arith.constant 0 : index
    %55 = vector.load %arg8[%c0_31, %c1, %c0_32, %c0_33] : memref<1x4x16x16xbf16, #tpu.memory_space<vmem>>, vector<1x1x16x16xbf16>
    %56 = vector.shape_cast %55 : vector<1x1x16x16xbf16> to vector<16x16xbf16>
    %57 = vector.shape_cast %54 : vector<16x16xbf16> to vector<1x1x16x16xbf16>
    tpu.vector_store %arg8[%c0_31, %c1, %c0_32, %c0_33], %57 {strides = array<i32>} : memref<1x4x16x16xbf16, #tpu.memory_space<vmem>>, vector<1x1x16x16xbf16>,
    %58 = vector.extract_strided_slice %36 {offsets = [0, 16], sizes = [16, 16], strides = [1, 1]} : vector<16x64xf32> to vector<16x16xf32>
    %59 = arith.truncf %58 : vector<16x16xf32> to vector<16x16xbf16>
    %c0_34 = arith.constant 0 : index
    %c1_35 = arith.constant 1 : index
    %c0_36 = arith.constant 0 : index
    %c0_37 = arith.constant 0 : index
    %60 = vector.load %arg9[%c0_34, %c1_35, %c0_36, %c0_37] : memref<1x4x16x16xbf16, #tpu.memory_space<vmem>>, vector<1x1x16x16xbf16>
    %61 = vector.shape_cast %60 : vector<1x1x16x16xbf16> to vector<16x16xbf16>
    %62 = vector.shape_cast %59 : vector<16x16xbf16> to vector<1x1x16x16xbf16>
    tpu.vector_store %arg9[%c0_34, %c1_35, %c0_36, %c0_37], %62 {strides = array<i32>} : memref<1x4x16x16xbf16, #tpu.memory_space<vmem>>, vector<1x1x16x16xbf16>,
    %63 = vector.extract_strided_slice %37 {offsets = [0, 16], sizes = [16, 16], strides = [1, 1]} : vector<16x64xf32> to vector<16x16xf32>
    %64 = arith.truncf %63 : vector<16x16xf32> to vector<16x16xbf16>
    %c0_38 = arith.constant 0 : index
    %c1_39 = arith.constant 1 : index
    %c0_40 = arith.constant 0 : index
    %c0_41 = arith.constant 0 : index
    %65 = vector.load %arg10[%c0_38, %c1_39, %c0_40, %c0_41] : memref<1x4x16x16xbf16, #tpu.memory_space<vmem>>, vector<1x1x16x16xbf16>
    %66 = vector.shape_cast %65 : vector<1x1x16x16xbf16> to vector<16x16xbf16>
    %67 = vector.shape_cast %64 : vector<16x16xbf16> to vector<1x1x16x16xbf16>
    tpu.vector_store %arg10[%c0_38, %c1_39, %c0_40, %c0_41], %67 {strides = array<i32>} : memref<1x4x16x16xbf16, #tpu.memory_space<vmem>>, vector<1x1x16x16xbf16>,
    %68 = vector.extract_strided_slice %35 {offsets = [0, 32], sizes = [16, 16], strides = [1, 1]} : vector<16x64xf32> to vector<16x16xf32>
    %69 = arith.truncf %68 : vector<16x16xf32> to vector<16x16xbf16>
    %c0_42 = arith.constant 0 : index
    %c2 = arith.constant 2 : index
    %c0_43 = arith.constant 0 : index
    %c0_44 = arith.constant 0 : index
    %70 = vector.load %arg8[%c0_42, %c2, %c0_43, %c0_44] : memref<1x4x16x16xbf16, #tpu.memory_space<vmem>>, vector<1x1x16x16xbf16>
    %71 = vector.shape_cast %70 : vector<1x1x16x16xbf16> to vector<16x16xbf16>
    %72 = vector.shape_cast %69 : vector<16x16xbf16> to vector<1x1x16x16xbf16>
    tpu.vector_store %arg8[%c0_42, %c2, %c0_43, %c0_44], %72 {strides = array<i32>} : memref<1x4x16x16xbf16, #tpu.memory_space<vmem>>, vector<1x1x16x16xbf16>,
    %73 = vector.extract_strided_slice %36 {offsets = [0, 32], sizes = [16, 16], strides = [1, 1]} : vector<16x64xf32> to vector<16x16xf32>
    %74 = arith.truncf %73 : vector<16x16xf32> to vector<16x16xbf16>
    %c0_45 = arith.constant 0 : index
    %c2_46 = arith.constant 2 : index
    %c0_47 = arith.constant 0 : index
    %c0_48 = arith.constant 0 : index
    %75 = vector.load %arg9[%c0_45, %c2_46, %c0_47, %c0_48] : memref<1x4x16x16xbf16, #tpu.memory_space<vmem>>, vector<1x1x16x16xbf16>
    %76 = vector.shape_cast %75 : vector<1x1x16x16xbf16> to vector<16x16xbf16>
    %77 = vector.shape_cast %74 : vector<16x16xbf16> to vector<1x1x16x16xbf16>
    tpu.vector_store %arg9[%c0_45, %c2_46, %c0_47, %c0_48], %77 {strides = array<i32>} : memref<1x4x16x16xbf16, #tpu.memory_space<vmem>>, vector<1x1x16x16xbf16>,
    %78 = vector.extract_strided_slice %37 {offsets = [0, 32], sizes = [16, 16], strides = [1, 1]} : vector<16x64xf32> to vector<16x16xf32>
    %79 = arith.truncf %78 : vector<16x16xf32> to vector<16x16xbf16>
    %c0_49 = arith.constant 0 : index
    %c2_50 = arith.constant 2 : index
    %c0_51 = arith.constant 0 : index
    %c0_52 = arith.constant 0 : index
    %80 = vector.load %arg10[%c0_49, %c2_50, %c0_51, %c0_52] : memref<1x4x16x16xbf16, #tpu.memory_space<vmem>>, vector<1x1x16x16xbf16>
    %81 = vector.shape_cast %80 : vector<1x1x16x16xbf16> to vector<16x16xbf16>
    %82 = vector.shape_cast %79 : vector<16x16xbf16> to vector<1x1x16x16xbf16>
    tpu.vector_store %arg10[%c0_49, %c2_50, %c0_51, %c0_52], %82 {strides = array<i32>} : memref<1x4x16x16xbf16, #tpu.memory_space<vmem>>, vector<1x1x16x16xbf16>,
    %83 = vector.extract_strided_slice %35 {offsets = [0, 48], sizes = [16, 16], strides = [1, 1]} : vector<16x64xf32> to vector<16x16xf32>
    %84 = arith.truncf %83 : vector<16x16xf32> to vector<16x16xbf16>
    %c0_53 = arith.constant 0 : index
    %c3 = arith.constant 3 : index
    %c0_54 = arith.constant 0 : index
    %c0_55 = arith.constant 0 : index
    %85 = vector.load %arg8[%c0_53, %c3, %c0_54, %c0_55] : memref<1x4x16x16xbf16, #tpu.memory_space<vmem>>, vector<1x1x16x16xbf16>
    %86 = vector.shape_cast %85 : vector<1x1x16x16xbf16> to vector<16x16xbf16>
    %87 = vector.shape_cast %84 : vector<16x16xbf16> to vector<1x1x16x16xbf16>
    tpu.vector_store %arg8[%c0_53, %c3, %c0_54, %c0_55], %87 {strides = array<i32>} : memref<1x4x16x16xbf16, #tpu.memory_space<vmem>>, vector<1x1x16x16xbf16>,
    %88 = vector.extract_strided_slice %36 {offsets = [0, 48], sizes = [16, 16], strides = [1, 1]} : vector<16x64xf32> to vector<16x16xf32>
    %89 = arith.truncf %88 : vector<16x16xf32> to vector<16x16xbf16>
    %c0_56 = arith.constant 0 : index
    %c3_57 = arith.constant 3 : index
    %c0_58 = arith.constant 0 : index
    %c0_59 = arith.constant 0 : index
    %90 = vector.load %arg9[%c0_56, %c3_57, %c0_58, %c0_59] : memref<1x4x16x16xbf16, #tpu.memory_space<vmem>>, vector<1x1x16x16xbf16>
    %91 = vector.shape_cast %90 : vector<1x1x16x16xbf16> to vector<16x16xbf16>
    %92 = vector.shape_cast %89 : vector<16x16xbf16> to vector<1x1x16x16xbf16>
    tpu.vector_store %arg9[%c0_56, %c3_57, %c0_58, %c0_59], %92 {strides = array<i32>} : memref<1x4x16x16xbf16, #tpu.memory_space<vmem>>, vector<1x1x16x16xbf16>,
    %93 = vector.extract_strided_slice %37 {offsets = [0, 48], sizes = [16, 16], strides = [1, 1]} : vector<16x64xf32> to vector<16x16xf32>
    %94 = arith.truncf %93 : vector<16x16xf32> to vector<16x16xbf16>
    %c0_60 = arith.constant 0 : index
    %c3_61 = arith.constant 3 : index
    %c0_62 = arith.constant 0 : index
    %c0_63 = arith.constant 0 : index
    %95 = vector.load %arg10[%c0_60, %c3_61, %c0_62, %c0_63] : memref<1x4x16x16xbf16, #tpu.memory_space<vmem>>, vector<1x1x16x16xbf16>
    %96 = vector.shape_cast %95 : vector<1x1x16x16xbf16> to vector<16x16xbf16>
    %97 = vector.shape_cast %94 : vector<16x16xbf16> to vector<1x1x16x16xbf16>
    tpu.vector_store %arg10[%c0_60, %c3_61, %c0_62, %c0_63], %97 {strides = array<i32>} : memref<1x4x16x16xbf16, #tpu.memory_space<vmem>>, vector<1x1x16x16xbf16>,
    return
  }
  func.func @transform_0(%arg0: i32, %arg1: i32) -> (i32, i32, i32) {
    %c0_i32 = arith.constant 0 : i32
    %c0_i32_0 = arith.constant 0 : i32
    return %arg0, %arg1, %c0_i32 : i32, i32, i32
  }
  func.func @transform_1(%arg0: i32, %arg1: i32) -> (i32, i32) {
    %c0_i32 = arith.constant 0 : i32
    %c0_i32_0 = arith.constant 0 : i32
    %c0_i32_1 = arith.constant 0 : i32
    return %c0_i32, %c0_i32_0 : i32, i32
  }
  func.func @transform_2(%arg0: i32, %arg1: i32) -> (i32, i32) {
    %c0_i32 = arith.constant 0 : i32
    %c0_i32_0 = arith.constant 0 : i32
    %c0_i32_1 = arith.constant 0 : i32
    return %c0_i32, %c0_i32_0 : i32, i32
  }
  func.func @transform_3(%arg0: i32, %arg1: i32) -> (i32, i32) {
    %c0_i32 = arith.constant 0 : i32
    %c0_i32_0 = arith.constant 0 : i32
    %c0_i32_1 = arith.constant 0 : i32
    return %c0_i32, %c0_i32_0 : i32, i32
  }
  func.func @transform_4(%arg0: i32, %arg1: i32) -> (i32, i32) {
    %c0_i32 = arith.constant 0 : i32
    %c0_i32_0 = arith.constant 0 : i32
    %c0_i32_1 = arith.constant 0 : i32
    return %c0_i32, %c0_i32_0 : i32, i32
  }
  func.func @transform_5(%arg0: i32, %arg1: i32) -> (i32, i32, i32) {
    %c0_i32 = arith.constant 0 : i32
    %c0_i32_0 = arith.constant 0 : i32
    return %arg0, %arg1, %c0_i32 : i32, i32, i32
  }
  func.func @transform_6(%arg0: i32, %arg1: i32) -> (i32, i32, i32, i32) {
    %c0_i32 = arith.constant 0 : i32
    %c0_i32_0 = arith.constant 0 : i32
    %c0_i32_1 = arith.constant 0 : i32
    return %arg0, %c0_i32, %arg1, %c0_i32_0 : i32, i32, i32, i32
  }
  func.func @transform_7(%arg0: i32, %arg1: i32) -> (i32, i32, i32, i32) {
    %c0_i32 = arith.constant 0 : i32
    %c0_i32_0 = arith.constant 0 : i32
    %c0_i32_1 = arith.constant 0 : i32
    return %arg0, %c0_i32, %arg1, %c0_i32_0 : i32, i32, i32, i32
  }
  func.func @transform_8(%arg0: i32, %arg1: i32) -> (i32, i32, i32, i32) {
    %c0_i32 = arith.constant 0 : i32
    %c0_i32_0 = arith.constant 0 : i32
    %c0_i32_1 = arith.constant 0 : i32
    return %arg0, %c0_i32, %arg1, %c0_i32_0 : i32, i32, i32, i32
  }
}

</mosaic_0001>

<bundles_post_ra>
// kernel: tpu_custom_call.1
= control target key start
LH: loop header
LB: loop body
LE: loop exit
PB: predicated region body
PF: predicated region fallthrough
CT: control target
= control target key end

     0   :  { %s1932_s0 = inlined_call_operand.hbm [shape: f32[2,32,64], index: 0, kind: input, shape index: {}]   ;;  %s1933_s1 = inlined_call_operand.vmem [shape: f32[1,64], index: 1, kind: input, shape index: {}]   ;;  %s1934_s2 = inlined_call_operand.hbm [shape: f32[1,64], index: 2, kind: input, shape index: {}]   ;;  %s1935_s3 = inlined_call_operand.hbm [shape: bf16[64,192], index: 3, kind: input, shape index: {}]   ;;  %s1936_s4 = inlined_call_operand.vmem [shape: f32[1,192], index: 4, kind: input, shape index: {}]   ;;  %s1937_s5 = inlined_call_operand.hbm [shape: f32[2,32,64], index: 5, kind: output, shape index: {0}]   ;;  %s1938_s6 = inlined_call_operand.vmem [shape: bf16[2,4,32,16], index: 6, kind: output, shape index: {1}]   ;;  %s1939_s7 = inlined_call_operand.vmem [shape: bf16[2,4,32,16], index: 7, kind: output, shape index: {2}]   ;;  %s1940_s8 = inlined_call_operand.vmem [shape: bf16[2,4,32,16], index: 8, kind: output, shape index: {3}]  }
   0x1   :  { %1955 = sst [smem:[#allocation19_spill]] %s1934_s2 }
   0x2   :  { %1956 = sst [smem:[#allocation20_spill]] %s1935_s3 }
   0x3   :  { %1957 = sst [smem:[#allocation21_spill]] %s1937_s5 }
   0x4   :  { %1958 = sst [smem:[#allocation22_spill]] %s1938_s6 }
   0x5   :  { %1959 = sst [smem:[#allocation23_spill]] %s1939_s7 }
   0x6   :  { %1960 = sst [smem:[#allocation24_spill]] %s1940_s8 }
   0x7   :  { %14 = vsyncpa [#allocation3], 0 }
   0x8   :  { %16 = vsyncpa [#allocation3 + $0x1], 0 }
   0x9   :  { %17 = vsyncpa [#allocation6], 0 }
   0xa   :  { %18 = vsyncpa [#allocation4], 0 }
   0xb   :  { %20 = vsyncpa [#allocation4 + $0x1], 0  ;;  %s1583_s27 = smov 0   ;;  %s1585_s28 = smov 0  }
   0xc   :  { %s1587_s29 = smov 0   ;;  %s1589_s30 = smov 0  }
   0xd   :  { %s1591_s9 = smov 0   ;;  %s1593_s10 = smov 0  }
   0xe   :  { %s1595_s11 = smov 0   ;;  %s1597_s12 = smov 0  }
   0xf LB: > { %1961 = sst [smem:[#allocation15_spill]] %s1492_s27  ;;  %s1136_s13 = sadd.s32 4294967295, %s1520_s12   ;;  %s1520_s12 = sphi %s1597_s12, %s26_s12   ;;  %s1516_s11 = sphi %s1595_s11, %s2000_s11   ;;  %s1512_s10 = sphi %s1593_s10, %s1999_s10   ;;  %s1508_s9 = sphi %s1591_s9, %s1998_s9   ;;  %s1504_s30 = sphi %s1589_s30, %s1997_s30   ;;  %s1500_s29 = sphi %s1587_s29, %s1996_s29   ;;  %s1496_s28 = sphi %s1585_s28, %s1995_s28   ;;  %s1492_s27 = sphi %s1583_s27, %s1994_s27  }
  0x10   : > { %1962 = sst [smem:[#allocation16_spill]] %s1520_s12  ;;  %s1137_s14 = sadd.s32 4294967294, %s1520_s12  }
  0x11   : > { %p54_p0 = scmp.ne.s32.totalorder %s1500_s29, %s1496_s28  ;;  %p55_p1 = scmp.eq.s32.totalorder %s1520_s12, 0 }
  0x12   : > { %p60_p2 = scmp.ne.s32.totalorder %s1496_s28, %s1492_s27  ;;  %p1631_p3 = scmp.eq.s32.totalorder %s1136_s13, 0 }
  0x13   : > { %p170_p4 = scmp.eq.s32.totalorder %s1136_s13, 3  ;;  %p1635_p5 = por %p55_p1, %p54_p0 }
  0x14   : > { %s1963_s16 = scalar_select %p1631_p3, 1, 0 }
  0x15   : > { %p176_p6 = scmp.eq.s32.totalorder %s1137_s14, 3  ;;  %p1641_p7 = por %p1631_p3, %p60_p2 }
  0x16   : > { %p1645_p8 = por %p170_p4, %p54_p0  ;;  %p1138_p10 = scmp.ge.s32.totalorder %s1520_s12, 1 }
  0x17   : > { %s1965_s18 = scalar_select %p1641_p7, 1, 0 }
  0x18   : > { %s1966_s19 = scalar_select %p1645_p8, 1, 0 }
  0x19   : > { %p1649_p9 = por %p176_p6, %p60_p2  ;;  %p267_p11 = scmp.lt.s32.totalorder %s1520_s12, 5 }
  0x1a   : > { %s1522_s22 = smov [#allocation5]   ;;  %p1242_p13 = scmp.lt.s32.totalorder %s1520_s12, 4 }
  0x1b   : > { %s1967_s20 = scalar_select %p1649_p9, 1, 0 }
  0x1c   : > { %p1655_p12 = pnand %p1138_p10, %p267_p11  ;;  %s283_s23 = sshll.u32 %s1522_s22, 4  ;;  %s284_s23 = int_to_ptr.vmem [resolvable:$true] %s283_s23 }
  0x1d   : > { %1968 = sst [smem:[#allocation17_spill]] %s1967_s20  ;;  %p1664_p1 = pnand %p1242_p13, %p1635_p5 }
  0x1e   : > { %s1969_s21 = scalar_select %p1655_p12, 1, 0 }
  0x1f   : > { %p1225_p0 = pneg %p1655_p12  ;;  %s1523_s25 = smov [#allocation7]  }
  0x20   : > { %s1970_s24 = scalar_select %p1664_p1, 1, 0 }
  0x21   : > { %s293_s26 = sshll.u32 %s1523_s25, 4  ;;  %p1670_p2 = pnand %p1225_p0, %p1631_p3  ;;  %s294_s26 = int_to_ptr.vmem [resolvable:$true] %s293_s26 }
  0x22   : > { %s1351_s14 = scalar_lea.vmem %s284_s23, 16  ;;  %s1358_s17 = scalar_lea.vmem %s284_s23, 32 }
  0x23   : > { %p1342_p4 = pneg %p1670_p2  ;;  %p1352_p6 = scmp.ne.s32.totalorder %s284_s23, %s1351_s14 }
  0x24   : > { %p1359_p11 = scmp.lt.s32.totalorder %s284_s23, %s284_s23  ;;  %p1360_p13 = scmp.lt.s32.totalorder %s1358_s17, %s1351_s14 }
  0x25   : > { %p1354_p5 = pnand %p1352_p6, %p1342_p4 }
  0x26   : > { %p1361_p9 = por %p1360_p13, %p1359_p11 }
  0x27   : > { %p1355_p10 = pneg %p1354_p5 }
  0x29   : > { %p1362_p8 = pnand %p1361_p9, %p1355_p10 }
  0x2b   : > { %1365 = shalt.err (!%p1362_p8)
}
  0x2c   : > { %s1972_s2 = sld [smem:[#allocation19_spill]]  ;;  %s1377_s15 = scalar_lea.vmem %s294_s26, 1024 }
  0x2d   : > { %p1378_p0 = scmp.ne.s32.totalorder %s294_s26, %s1377_s15  ;;  %p1385_p5 = scmp.lt.s32.totalorder %s294_s26, %s294_s26 }
  0x2e   : > { %p1386_p7 = scmp.lt.s32.totalorder %s1377_s15, %s1377_s15 }
  0x2f   : > { %p1380_p3 = pnand %p1378_p0, %p1342_p4 }
  0x30   : > { %p1387_p12 = por %p1386_p7, %p1385_p5 }
  0x31   : > { %p1381_p6 = pneg %p1380_p3 }
  0x32   : > { %1228 = dma.hbm_to_vmem [thread:$0]  (!%p1670_p2), %s1972_s2, 16, %s284_s23, [#allocation6]  }
  0x33   : > { %p1388_p1 = pnand %p1387_p12, %p1381_p6 }
  0x35   : > { %1391 = shalt.err (!%p1388_p1)
}
  0x36   : > { %s1951_s14 = smov 128   ;;  %s1952_s23 = smov 8  }
  0x37   : > { %s1973_s3 = sld [smem:[#allocation20_spill]]  ;;  %s35_s15 = sadd.s32 1, %s1512_s10 }
  0x38   : > { %s38_s25 = sadd.s32 1, %s1516_s11  ;;  %p36_p3 = scmp.ge.s32.totalorder %s35_s15, 2 }
  0x39   : > { %s310_s2 = sand.u32 1, %s1500_s29   ;;  %s1143_s13 = sshll.u32 %s1512_s10, 1 }
  0x3a   : > { %s1142_s20 = sshll.u32 %s310_s2, 4  ;;  %s2002_s15 = smov (%p36_p3, %s35_s15), 0 }
  0x3b   : > { %1974 = sst [smem:[#allocation18_spill]] %s2002_s15  ;;  %s2004_s25 = smov (!%p36_p3, %s38_s25), %s1516_s11 }
  0x3c   : > { %s43_s27 = ssub.s32 %s1512_s10, %s2002_s15  ;;  %p40_p7 = scmp.ge.s32.totalorder %s2004_s25, 2 }
  0x3d   : > { %1231 = dma.hbm_to_vmem [thread:$0]  (!%p1670_p2), %s1973_s3, 1024, %s294_s26, [#allocation6], %s1951_s14, %s1951_s14, %s1952_s23  }
  0x3e   : > { %s1144_s12 = sshll.u32 %s1516_s11, 2  ;;  %s314_s8 = scalar_lea.vmem [#allocation2], %s1142_s20 }
  0x3f   : > { %s323_s7 = sshll.u32 %s314_s8, 4  ;;  %s2006_s25 = smov (%p40_p7, %s2004_s25), 0  ;;  %s324_s7 = int_to_ptr.vmem [resolvable:$true] %s323_s7 }
  0x40   : > { %s320_s26 = sadd.s32 %s1144_s12, %s1143_s13  ;;  %s42_s17 = ssub.s32 %s1516_s11, %s2006_s25 }
  0x41   : > { %s1145_s22 = sshll.u32 %s320_s26, 7  ;;  %s44_s14 = sor.u32 %s43_s27, %s42_s17 }
  0x42   : > { %s322_s6 = scalar_lea.hbm %s1932_s0, %s1145_s22  ;;  %p45_p8 = scmp.eq.s32.totalorder %s44_s14, 0 }
  0x43   : > { %s311_s5 = scalar_lea.sflag [#allocation3], %s310_s2  ;;  %p1975_p9 = scmp.ne.s32.totalorder %s1970_s24, 0 }
  0x44   : > { %s1405_s15 = scalar_lea.vmem %s324_s7, 256  ;;  %s1526_s8 = smov [#allocation2]  }
  0x45   : > { %p1394_p12 = pneg %p1975_p9  ;;  %p1406_p1 = scmp.ne.s32.totalorder %s324_s7, %s1405_s15 }
  0x46   : > { %s1410_s20 = sshll.u32 %s1526_s8, 4  ;;  %s1411_s20 = int_to_ptr.vmem [resolvable:$false] %s1410_s20 }
  0x47   : > { %p1408_p2 = pnand %p1406_p1, %p1394_p12  ;;  %s1412_s12 = scalar_lea.vmem %s1411_s20, 512 }
  0x48   : > { %p1413_p10 = scmp.lt.s32.totalorder %s324_s7, %s1411_s20  ;;  %p1414_p11 = scmp.lt.s32.totalorder %s1412_s12, %s1405_s15 }
  0x49   : > { %p1409_p4 = pneg %p1408_p2 }
  0x4a   : > { %p1415_p13 = por %p1414_p11, %p1413_p10 }
  0x4c   : > { %p1416_p0 = pnand %p1415_p13, %p1409_p4 }
  0x4e   : > { %1419 = shalt.err (!%p1416_p0)
}
  0x4f   : > { %s1976_s3 = smov 8   ;;  %s1977_s27 = smov 128  }
  0x50   : > { %1235 = dma.hbm_to_vmem [thread:$0]  (!%p1975_p9), %s322_s6, 256, %s324_s7, %s311_s5, %s1977_s27, %s1977_s27, %s1976_s3  }
  0x51   : > { %s1978_s2 = sadd.s32 1, %s1500_s29  ;;  %p1979_p6 = scmp.ne.s32.totalorder %s1969_s21, 0 }
  0x52   : > { %s1723_s23 = scalar_select %p45_p8, %s1500_s29, %s1978_s2  }
  0x53   : > { %335 = sbr.rel (%p1979_p6) target bundleno = 798 (0x31e), region = 40  ;;  %s1728_s15 = sand.u32 (!%p1979_p6), 1, %s1496_s28  }
  0x54   : > { %s1147_s24 = sshll.u32 (!%p1979_p6), %s1728_s15, 4  ;;  %s338_s13 = scalar_lea.sflag (!%p1979_p6), [#allocation3], %s1728_s15 }
  0x55   : > { %s341_s26 = scalar_lea.vmem (!%p1979_p6), [#allocation2], %s1147_s24  ;;  %p1980_p5 = scmp.ne.s32.totalorder (!%p1979_p6), %s1965_s18, 0 }
  0x58   : > { %1479 = dma.done.wait (%p1980_p5), %s338_s13, 256  }
  0x59   : > { %1481 = vsyncadd (%p1980_p5), %s338_s13, 4294967040  ;;  %p1981_p3 = scmp.ne.s32.totalorder %s1963_s16, 0 }
  0x5b   : > { %1483 = dma.done.wait (%p1981_p3), [#allocation6], 1040  }
  0x5c   : > { %1485 = vsyncadd (%p1981_p3), [#allocation6], 4294966256  ;;  %vm404_vm0 = vcmask 523264   ;;  %v400_v0 = vld [vmem:[%s341_s26] sm:$0xff]  ;;  %v401_v1 = vld [vmem:[%s341_s26 + $0x8] sm:$0xff]  ;;  %v1527_v18 = vmov 0   ;;  %v461_v40 = vlaneseq }
  0x5d   : > { %v405_v2 = vsel %vm404_vm0, %v400_v0, 0.0  ;;  %v408_v3 = vsel %vm404_vm0, %v401_v1, 0.0  ;;  %v1324_v14 = vld [vmem:[#allocation7 + $0x34] ss:$8 sps:$4 sm:$0xff]   ;;  %v1326_v15 = vld [vmem:[#allocation7 + $0x30] ss:$8 sps:$4 sm:$0xff]   ;;  %546 = vmatprep.mubr.bf16.mxu0 %v1527_v18 }
  0x5e   : > { %406 = vadd.xlane.f32.xlu0 %v405_v2  ;;  %v1327_v16 = vld [vmem:[#allocation7 + $0x24] ss:$8 sps:$4 sm:$0xff]   ;;  %522 = vmatprep.subr.bf16.mxu0 %v1324_v14  ;;  %v1329_v17 = vld [vmem:[#allocation7 + $0x20] ss:$8 sps:$4 sm:$0xff]   ;;  %v1330_v19 = vld [vmem:[#allocation7 + $0x14] ss:$8 sps:$4 sm:$0xff]  }
  0x5f   : > { %523 = vmatpush1.bf16.msra.mxu0 %v1326_v15  ;;  %v1332_v20 = vld [vmem:[#allocation7 + $0x10] ss:$8 sps:$4 sm:$0xff]   ;;  %v1333_v21 = vld [vmem:[#allocation7 + $0x4] ss:$8 sps:$4 sm:$0xff]   ;;  %v1335_v22 = vld [vmem:[#allocation7] ss:$8 sps:$4 sm:$0xff]  }
  0x60   : > { %524 = vmatprep.subr.bf16.mxu0 %v1327_v16  ;;  %v1154_v30 = vld [vmem:[%s1933_s1] ss:$0 sm:$0xff]  ;;  %s1751_s7 = scalar_lea.vmem [#allocation8], %s1147_s24  ;;  %v462_v41 = vshrl.u32 %v461_v40, 7  ;;  %s1762_s21 = sshll.u32 %s1728_s15, 5  ;;  %vm567_vm1 = vcmask 125952  }
  0x61   : > { %v1155_v32 = vld [vmem:[#allocation5] ss:$0 sm:$0xff]  ;;  %s1528_s14 = smov 64   ;;  %s1767_s17 = scalar_lea.vmem [#allocation9], %s1762_s21 }
  0x62   : > { %409 = vadd.xlane.f32.xlu0 %v408_v3  ;;  %v463_v42 = vsub.s32 0, %v462_v41  ;;  %v459_v43 = vld [vmem:[%s1936_s4] sm:$0x3]  ;;  %v467_v44 = vsub.s32 1, %v462_v41  ;;  %s1772_s22 = scalar_lea.vmem [#allocation11], %s1762_s21  ;;  %s1529_s8 = smov 112  }
  0x63   : > { %525 = vmatpush1.bf16.msra.mxu0 %v1329_v17  ;;  %s1530_s20 = smov 48   ;;  %s1531_s12 = smov 32  }
  0x64   : > { %526 = vmatprep.subr.bf16.mxu0 %v1330_v19  ;;  %v464_v45 = vrot.slane %v459_v43, %v463_v42  ;;  %v468_v46 = vrot.slane %v459_v43, %v467_v44  ;;  %s1532_s3 = smov 16   ;;  %s1533_s27 = smov 96  }
  0x65   : > { %s1786_s2 = sshll.u32 %s1504_s30, 1  ;;  %s1194_s24 = sshll.u32 %s1508_s9, 2 }
  0x66   : > { %s700_s13 = sadd.s32 %s1194_s24, %s1786_s2  ;;  %s703_s5 = sshll.u32 %s1751_s7, 4  ;;  %s1797_s5 = int_to_ptr.vmem [resolvable:$true] %s703_s5 }
  0x67   : > { %527 = vmatpush1.bf16.msra.mxu0 %v1332_v20  ;;  %s1195_s26 = sshll.u32 %s700_s13, 7  ;;  %s1534_s6 = smov 80  }
  0x68   : > { %528 = vmatprep.subr.bf16.mxu0 %v1333_v21  ;;  %s676_s30 = scalar_lea.sflag [#allocation4], %s1728_s15  ;;  %p1983_p8 = scmp.ne.s32.totalorder %s1966_s19, 0 }
  0x6b   : > { %529 = vmatpush1.bf16.msra.mxu0 %v1335_v22 }
  0xe7   : > { %v407_v4 = vpop.xlane.xlu0 %406 }
  0xe8   : > { %v412_v5 = vmul.f32 0.015625, %v407_v4 }
  0xea   : > { %v414_v6 = vsub.f32 %v400_v0, %v412_v5 }
  0xeb   : > { %v410_v7 = vpop.xlane.xlu0 %409 }
  0xec   : > { %v413_v8 = vmul.f32 0.015625, %v410_v7  ;;  %v416_v9 = vmul.f32 %v414_v6, %v414_v6 }
  0xee   : > { %v415_v10 = vsub.f32 %v401_v1, %v413_v8  ;;  %v418_v11 = vsel %vm404_vm0, %v416_v9, 0.0 }
  0xef   : > { %419 = vadd.xlane.f32.xlu1 %v418_v11 }
  0xf0   : > { %v417_v12 = vmul.f32 %v415_v10, %v415_v10 }
  0xf2   : > { %v421_v13 = vsel %vm404_vm0, %v417_v12, 0.0 }
  0xf3   : > { %422 = vadd.xlane.f32.xlu1 %v421_v13 }
 0x178   : > { %v420_v23 = vpop.xlane.xlu1 %419 }
 0x179   : > { %v424_v24 = vmul.f32 0.015625, %v420_v23 }
 0x17b   : > { %v426_v25 = vadd.f32 1e-05, %v424_v24 }
 0x17c   : > { %v423_v26 = vpop.xlane.xlu1 %422 }
 0x17d   : > { %1336 = vrsqrt.f32 %v426_v25  ;;  %v425_v27 = vmul.f32 0.015625, %v423_v26 }
 0x17f   : > { %v427_v28 = vadd.f32 1e-05, %v425_v27 }
 0x181   : > { %1338 = vrsqrt.f32 %v427_v28 }
 0x18a   : > { %v1337_v29 = vpop.eup %1336 }
 0x18b   : > { %v430_v31 = vmul.f32 %v1337_v29, %v414_v6 }
 0x18d   : > { %v438_v33 = vmul.f32 %v1154_v30, %v430_v31 }
 0x18e   : > { %v1339_v34 = vpop.eup %1338 }
 0x18f   : > { %v431_v35 = vmul.f32 %v1339_v34, %v415_v10  ;;  %v446_v36 = vadd.f32 %v1155_v32, %v438_v33 }
 0x191   : > { %v439_v37 = vmul.f32 %v1154_v30, %v431_v35  ;;  %448 = vst.msk [vmem:[%s1751_s7] sm:$0xff] %vm404_vm0, %v446_v36 }
 0x193   : > { %v447_v38 = vadd.f32 %v1155_v32, %v439_v37 }
 0x195   : > { %v450_v39 = vpack.c.bf16 %v447_v38, %v446_v36  ;;  %449 = vst.msk [vmem:[%s1751_s7 + $0x8] sm:$0xff] %vm404_vm0, %v447_v38  ;;  %s1535_s7 = smov [#allocation8]  }
 0x197   : > { %1164 = vmatmul.mubr.msk.bf16.vlgmr.msra.gmra.mxu0 %vm404_vm0, %v450_v39 }
 0x257   : > { %v548_v47 = vpop.f32.mrf.mxu0 }
 0x258   : > { %v549_v48 = vadd.f32 %v548_v47, %v464_v45 }
 0x259   : > { %v550_v49 = vpop.f32.mrf.mxu0 }
 0x25a   : > { %v557_v50 = vmul.f32 0.25, %v549_v48  ;;  %v1209_v51 = vpack.c.bf16 %v549_v48, %v549_v48  ;;  %v551_v52 = vadd.f32 %v550_v49, %v468_v46 }
 0x25b   : > { %v552_v53 = vpop.f32.mrf.mxu0 }
 0x25c   : > { %v1207_v54 = vpack.c.bf16 %v557_v50, %v557_v50  ;;  %v1764_v55 = vpack.c.bf16 %v551_v52, %v551_v52  ;;  %v553_v56 = vadd.f32 %v552_v53, %v464_v45  ;;  %576 = vrot.lane.b32.xlu0 %v1209_v51, %s1528_s14 }
 0x25d   : > { %v554_v57 = vpop.f32.mrf.mxu0 }
 0x25e   : > { %568 = vst.msk [vmem:[%s1767_s17] sm:$0xf] %vm567_vm1, %v1207_v54  ;;  %592 = vst.msk [vmem:[%s1772_s22] sm:$0xf] %vm567_vm1, %v1764_v55  ;;  %v558_v58 = vmul.f32 0.25, %v553_v56  ;;  %v555_v59 = vadd.f32 %v554_v57, %v468_v46  ;;  %594 = vrot.lane.b32.xlu1 %v1207_v54, %s1529_s8  ;;  %v1210_v61 = vpack.c.bf16 %v553_v56, %v553_v56 }
 0x260   : > { %v1208_v60 = vpack.c.bf16 %v558_v58, %v558_v58  ;;  %v1212_v62 = vpack.c.bf16 %v555_v59, %v555_v59  ;;  %603 = vrot.lane.b32.xlu0 %v1209_v51, %s1530_s20 }
 0x262   : > { %569 = vst.msk [vmem:[%s1767_s17 + $0x4] sm:$0xf] %vm567_vm1, %v1208_v60  ;;  %593 = vst.msk [vmem:[%s1772_s22 + $0x4] sm:$0xf] %vm567_vm1, %v1212_v62  ;;  %578 = vrot.lane.b32.xlu1 %v1210_v61, %s1528_s14  ;;  %s1982_s14 = sld [smem:[#allocation21_spill]] }
 0x264   : > { %630 = vrot.lane.b32.xlu0 %v1209_v51, %s1531_s12 }
 0x266   : > { %605 = vrot.lane.b32.xlu1 %v1210_v61, %s1530_s20 }
 0x268   : > { %657 = vrot.lane.b32.xlu0 %v1209_v51, %s1532_s3  ;;  %s1795_s20 = scalar_lea.hbm %s1982_s14, %s1195_s26 }
 0x26a   : > { %632 = vrot.lane.b32.xlu1 %v1210_v61, %s1531_s12  ;;  %s1424_s12 = sshll.u32 %s1535_s7, 4  ;;  %s1425_s12 = int_to_ptr.vmem [resolvable:$false] %s1424_s12 }
 0x26b   : > { %p1427_p1 = scmp.lt.s32.totalorder %s1797_s5, %s1425_s12 }
 0x26c   : > { %612 = vrot.lane.b32.xlu0 %v1764_v55, %s1529_s8 }
 0x26e   : > { %659 = vrot.lane.b32.xlu1 %v1210_v61, %s1532_s3  ;;  %s1426_s3 = scalar_lea.vmem %s1425_s12, 512 }
 0x270   : > { %621 = vrot.lane.b32.xlu0 %v1207_v54, %s1533_s27 }
 0x272   : > { %596 = vrot.lane.b32.xlu1 %v1208_v60, %s1529_s8 }
 0x274   : > { %639 = vrot.lane.b32.xlu0 %v1764_v55, %s1533_s27 }
 0x276   : > { %614 = vrot.lane.b32.xlu1 %v1212_v62, %s1529_s8  ;;  %s1420_s8 = scalar_lea.vmem %s1797_s5, 256 }
 0x277   : > { %p1421_p7 = scmp.ne.s32.totalorder %s1797_s5, %s1420_s8  ;;  %p1428_p2 = scmp.lt.s32.totalorder %s1426_s3, %s1420_s8 }
 0x278   : > { %648 = vrot.lane.b32.xlu0 %v1207_v54, %s1534_s6 }
 0x279   : > { %p1422_p9 = pnand %p1421_p7, %p1983_p8  ;;  %p1429_p4 = por %p1428_p2, %p1427_p1 }
 0x27a   : > { %623 = vrot.lane.b32.xlu1 %v1208_v60, %s1533_s27 }
 0x27b   : > { %p1423_p12 = pneg %p1422_p9 }
 0x27d   : > { %p1430_p10 = pnand %p1429_p4, %p1423_p12 }
 0x27f   : > { %1433 = shalt.err (!%p1430_p10)
}
 0x280   : > { %s1434_s24 = scalar_lea.hbm %s1795_s20, 256  ;;  %s1438_s16 = scalar_lea.hbm %s1982_s14, 1024 }
 0x281   : > { %p1435_p11 = scmp.ne.s32.totalorder %s1795_s20, %s1434_s24  ;;  %p1439_p6 = scmp.lt.s32.totalorder %s1795_s20, %s1982_s14 }
 0x282   : > { %p1440_p5 = scmp.lt.s32.totalorder %s1438_s16, %s1434_s24 }
 0x283   : > { %p1436_p13 = pnand %p1435_p11, %p1983_p8 }
 0x284   : > { %p1441_p3 = por %p1440_p5, %p1439_p6 }
 0x285   : > { %p1437_p0 = pneg %p1436_p13 }
 0x287   : > { %p1442_p7 = pnand %p1441_p3, %p1437_p0 }
 0x289   : > { %1445 = shalt.err (!%p1442_p7)
}
 0x28a   : > { %s1536_s8 = smov 128   ;;  %s1537_s12 = smov 8   ;;  %666 = vrot.lane.b32.xlu0 %v1764_v55, %s1534_s6  ;;  %641 = vrot.lane.b32.xlu1 %v1212_v62, %s1533_s27  ;;  %v734_v19 = vld [vmem:[%s1767_s17] sm:$0xff] (%p1983_p8)  }
 0x28b   : > { %1223 = dma.vmem_to_hbm [thread:$0]  (%p1983_p8), %s1797_s5, 256, %s1795_s20, %s676_s30, %s1536_s8, %s1536_s8, %s1537_s12  }
 0x28c   : > { %s1829_s3 = scalar_lea.vmem [#allocation10], %s1762_s21  ;;  %s1197_s15 = sshll.u32 (%p1983_p8), %s1508_s9, 4 }
 0x28d   : > { %s715_s21 = sadd.s32 (%p1983_p8), %s1197_s15, %s1786_s2  ;;  %s1984_s20 = sld [smem:[#allocation22_spill]] (%p1983_p8) }
 0x28e   : > { %650 = vrot.lane.b32.xlu1 %v1208_v60, %s1534_s6  ;;  %s1198_s27 = sshll.u32 (%p1983_p8), %s715_s21, 2 }
 0x292   : > { %668 = vrot.lane.b32.xlu1 %v1212_v62, %s1534_s6 }
 0x293   : > { %s717_s30 = scalar_lea.vmem (%p1983_p8), %s1984_s20, %s1198_s27 }
 0x294   : > { %735 = vst [vmem:[%s717_s30] sm:$0xff] (%p1983_p8), %v734_v19  }
 0x2ce   : > { %v577_v63 = vpop.permute.xlu0 %576 }
 0x2cf   : > { %582 = vst.msk [vmem:[%s1829_s3] sm:$0xf] %vm567_vm1, %v577_v63 }
 0x2d0   : > { %v595_v0 = vpop.permute.xlu1 %594 }
 0x2d1   : > { %1171 = vst.msk [vmem:[%s1767_s17 + $0x8] sm:$0xf] %vm567_vm1, %v595_v0 }
 0x2d2   : > { %v604_v1 = vpop.permute.xlu0 %603 }
 0x2d3   : > { %1173 = vst.msk [vmem:[%s1829_s3 + $0x8] sm:$0xf] %vm567_vm1, %v604_v1 }
 0x2d4   : > { %v579_v2 = vpop.permute.xlu1 %578 }
 0x2d5   : > { %583 = vst.msk [vmem:[%s1829_s3 + $0x4] sm:$0xf] %vm567_vm1, %v579_v2 }
 0x2d6   : > { %v631_v3 = vpop.permute.xlu0 %630 }
 0x2d7   : > { %1179 = vst.msk [vmem:[%s1829_s3 + $0x10] sm:$0xf] %vm567_vm1, %v631_v3 }
 0x2d8   : > { %v606_v4 = vpop.permute.xlu1 %605 }
 0x2d9   : > { %1174 = vst.msk [vmem:[%s1829_s3 + $0xc] sm:$0xf] %vm567_vm1, %v606_v4 }
 0x2da   : > { %v658_v5 = vpop.permute.xlu0 %657 }
 0x2db   : > { %1185 = vst.msk [vmem:[%s1829_s3 + $0x18] sm:$0xf] %vm567_vm1, %v658_v5 }
 0x2dc   : > { %v633_v6 = vpop.permute.xlu1 %632 }
 0x2dd   : > { %1180 = vst.msk [vmem:[%s1829_s3 + $0x14] sm:$0xf] %vm567_vm1, %v633_v6 }
 0x2de   : > { %v613_v7 = vpop.permute.xlu0 %612 }
 0x2df   : > { %1175 = vst.msk [vmem:[%s1772_s22 + $0x8] sm:$0xf] %vm567_vm1, %v613_v7 }
 0x2e0   : > { %v660_v8 = vpop.permute.xlu1 %659 }
 0x2e1   : > { %1186 = vst.msk [vmem:[%s1829_s3 + $0x1c] sm:$0xf] %vm567_vm1, %v660_v8 }
 0x2e2   : > { %v622_v9 = vpop.permute.xlu0 %621 }
 0x2e3   : > { %1177 = vst.msk [vmem:[%s1767_s17 + $0x10] sm:$0xf] %vm567_vm1, %v622_v9 }
 0x2e4   : > { %v597_v10 = vpop.permute.xlu1 %596 }
 0x2e5   : > { %1172 = vst.msk [vmem:[%s1767_s17 + $0xc] sm:$0xf] %vm567_vm1, %v597_v10 }
 0x2e6   : > { %v640_v11 = vpop.permute.xlu0 %639 }
 0x2e7   : > { %1181 = vst.msk [vmem:[%s1772_s22 + $0x10] sm:$0xf] %vm567_vm1, %v640_v11 }
 0x2e8   : > { %v615_v12 = vpop.permute.xlu1 %614 }
 0x2e9   : > { %1176 = vst.msk [vmem:[%s1772_s22 + $0xc] sm:$0xf] %vm567_vm1, %v615_v12 }
 0x2ea   : > { %v649_v13 = vpop.permute.xlu0 %648 }
 0x2eb   : > { %1183 = vst.msk [vmem:[%s1767_s17 + $0x18] sm:$0xf] %vm567_vm1, %v649_v13 }
 0x2ec   : > { %v624_v14 = vpop.permute.xlu1 %623  ;;  %v738_v20 = vld [vmem:[%s1767_s17 + $0x8] sm:$0xff] (%p1983_p8)  }
 0x2ed   : > { %1178 = vst.msk [vmem:[%s1767_s17 + $0x14] sm:$0xf] %vm567_vm1, %v624_v14  ;;  %739 = vst [vmem:[%s717_s30 + $0x10] sm:$0xff] (%p1983_p8), %v738_v20  }
 0x2f4   : > { %v742_v21 = vld [vmem:[%s1767_s17 + $0x10] sm:$0xff] (%p1983_p8)  }
 0x2f5   : > { %743 = vst [vmem:[%s717_s30 + $0x20] sm:$0xff] (%p1983_p8), %v742_v21  }
 0x2fc   : > { %v667_v15 = vpop.permute.xlu0 %666  ;;  %v642_v16 = vpop.permute.xlu1 %641 }
 0x2fd   : > { %1187 = vst.msk [vmem:[%s1772_s22 + $0x18] sm:$0xf] %vm567_vm1, %v667_v15  ;;  %1182 = vst.msk [vmem:[%s1772_s22 + $0x14] sm:$0xf] %vm567_vm1, %v642_v16 }
 0x300   : > { %v651_v17 = vpop.permute.xlu1 %650 }
 0x301   : > { %1184 = vst.msk [vmem:[%s1767_s17 + $0x1c] sm:$0xf] %vm567_vm1, %v651_v17  ;;  %712 = sbr.rel (!%p1983_p8) target bundleno = 778 (0x30a), region = 60 }
 0x304   : > { %v669_v18 = vpop.permute.xlu1 %668 }
 0x305   : > { %1188 = vst.msk [vmem:[%s1772_s22 + $0x1c] sm:$0xf] %vm567_vm1, %v669_v18 }
 0x308   : > { %v746_v22 = vld [vmem:[%s1767_s17 + $0x18] sm:$0xff]  }
 0x309   : > { %747 = vst [vmem:[%s717_s30 + $0x30] sm:$0xff] %v746_v22  }
 0x30a PF: > { %p1985_p8 = scmp.ne.s32.totalorder %s1966_s19, 0 }
 0x30b   : > { %s1200_s17 = sshll.u32 (%p1985_p8), %s1508_s9, 4  ;;  %v811_v23 = vld [vmem:[%s1829_s3] sm:$0xff] (%p1985_p8)   ;;  %v815_v24 = vld [vmem:[%s1829_s3 + $0x8] sm:$0xff] (%p1985_p8)   ;;  %v819_v25 = vld [vmem:[%s1829_s3 + $0x10] sm:$0xff] (%p1985_p8)   ;;  %s1986_s18 = sld [smem:[#allocation23_spill]] (%p1985_p8) }
 0x30c   : > { %789 = sbr.rel (!%p1985_p8) target bundleno = 788 (0x314), region = 101  ;;  %s792_s24 = sadd.s32 (%p1985_p8), %s1200_s17, %s1786_s2  ;;  %v823_v26 = vld [vmem:[%s1829_s3 + $0x18] sm:$0xff] (%p1985_p8)  }
 0x30d   : > { %s1201_s13 = sshll.u32 (%p1985_p8), %s792_s24, 2 }
 0x311   : > { %s794_s7 = scalar_lea.vmem %s1986_s18, %s1201_s13 }
 0x312   : > { %812 = vst [vmem:[%s794_s7] sm:$0xff] %v811_v23   ;;  %816 = vst [vmem:[%s794_s7 + $0x10] sm:$0xff] %v815_v24  }
 0x313   : > { %820 = vst [vmem:[%s794_s7 + $0x20] sm:$0xff] %v819_v25   ;;  %824 = vst [vmem:[%s794_s7 + $0x30] sm:$0xff] %v823_v26  }
 0x314 PF: > { %p1987_p9 = scmp.ne.s32.totalorder %s1966_s19, 0 }
 0x315   : > { %s1203_s8 = sshll.u32 (%p1987_p9), %s1508_s9, 4  ;;  %v888_v27 = vld [vmem:[%s1772_s22] sm:$0xff] (%p1987_p9)   ;;  %v892_v28 = vld [vmem:[%s1772_s22 + $0x8] sm:$0xff] (%p1987_p9)   ;;  %v896_v29 = vld [vmem:[%s1772_s22 + $0x10] sm:$0xff] (%p1987_p9)   ;;  %s1988_s27 = sld [smem:[#allocation24_spill]] (%p1987_p9) }
 0x316   : > { %866 = sbr.rel (!%p1987_p9) target bundleno = 798 (0x31e), region = 142  ;;  %s869_s12 = sadd.s32 (%p1987_p9), %s1203_s8, %s1786_s2  ;;  %v900_v30 = vld [vmem:[%s1772_s22 + $0x18] sm:$0xff] (%p1987_p9)  }
 0x317   : > { %s1204_s3 = sshll.u32 (%p1987_p9), %s869_s12, 2 }
 0x31b   : > { %s871_s5 = scalar_lea.vmem %s1988_s27, %s1204_s3 }
 0x31c   : > { %889 = vst [vmem:[%s871_s5] sm:$0xff] %v888_v27   ;;  %893 = vst [vmem:[%s871_s5 + $0x10] sm:$0xff] %v892_v28  }
 0x31d   : > { %897 = vst [vmem:[%s871_s5 + $0x20] sm:$0xff] %v896_v29   ;;  %901 = vst [vmem:[%s871_s5 + $0x30] sm:$0xff] %v900_v30  }
 0x31e PF: > { %s1989_s19 = sld [smem:[#allocation16_spill]] }
 0x31f   : > { %s1990_s6 = sld [smem:[#allocation15_spill]] }
 0x320   : > { %s1991_s20 = sld [smem:[#allocation17_spill]] }
 0x324   : > { %p1245_p12 = scmp.ge.s32.totalorder %s1989_s19, 2 }
 0x325   : > { %s949_s9 = sand.u32 1, %s1990_s6  }
 0x326   : > { %p1992_p1 = scmp.ne.s32.totalorder %s1991_s20, 0  ;;  %s950_s22 = scalar_lea.sflag [#allocation4], %s949_s9 }
 0x328   : > { %p1237_p2 = pnand %p1245_p12, %p1992_p1 }
 0x32a   : > { %p1238_p4 = pneg %p1237_p2 }
 0x32c   : > { %1487 = dma.done.wait (%p1238_p4), %s950_s22, 256  }
 0x32d   : > { %1489 = vsyncadd (%p1238_p4), %s950_s22, 4294967040  ;;  %s26_s12 = sadd.s32 1, %s1989_s19   ;;  %s1993_s2 = sld [smem:[#allocation18_spill]] }
 0x32e   : > { %p23_p10 = scmp.ge.s32.totalorder %s26_s12, 6   ;;  %s1994_s27 = smov %s1496_s28 }
 0x32f   : > { %s1995_s28 = smov %s1500_s29  ;;  %s1996_s29 = smov %s1723_s23 }
 0x330   : > { %s1997_s30 = smov %s1512_s10  ;;  %s1998_s9 = smov %s1516_s11 }
 0x331   : > { %s2000_s11 = smov %s2006_s25  ;;  %25 = sbr.rel (!%p23_p10) target bundleno = 15 (0xf), region = 261 }
 0x333   : > { %s1999_s10 = smov %s1993_s2 }
 0x336   :  { %976 = vsyncpa [#allocation3], 1 }
 0x337   :  { %978 = vsyncpa [#allocation3 + $0x1], 1 }
 0x338   :  { %979 = vsyncpa [#allocation6], 1 }
 0x339   :  { %980 = vsyncpa [#allocation4], 1 }
 0x33a   :  { %982 = vsyncpa [#allocation4 + $0x1], 1 }

</bundles_post_ra>
